<compile_context>
chip_gen: v7x
topology: tpu7x:2x2x1
jax: 0.10.0
libtpu: 0.0.40
codegen_flags: <defaults>
</compile_context>

<pallas_src>
import jax
import jax.numpy as jnp
from jax.experimental import pallas as pl
from jax.experimental.pallas import tpu as pltpu


def _round_up(n, m):
    return ((n + m - 1) // m) * m


def _conv_matmul_kernel(w_ref, b_ref, p_ref, o_ref):
    # w: [C_out_pad, KD_pad]  (resident)
    # b: [C_out_pad, 1]       (resident)
    # p: [KD_pad, TM]         (streamed per grid step)
    # o: [C_out_pad, TM]      (lane-dense store)
    acc = jnp.dot(w_ref[...], p_ref[...], preferred_element_type=jnp.float32)
    o_ref[...] = acc + b_ref[...]


def conv1d_pallas(x, weight, bias, stride, *, compute_dtype=jnp.float32, tile_m=512):
    """Conv1d forward.

    x:      [B, C_in, L]        (NCL, like PyTorch)
    weight: [C_out, C_in, K]
    bias:   [C_out]
    compute_dtype: jnp.float32 (default) or jnp.bfloat16 (v6e/v7x MXU fast path;
                   accumulation stays f32).
    tile_m: tile along M = B*L_out (must be a multiple of 128).
    returns [B, C_out, L_out]  (float32)
    """
    B, C_in, L = x.shape
    C_out, _, K = weight.shape
    L_out = (L - K) // stride + 1
    M = B * L_out
    KD = C_in * K

    # Padded / tiled sizes.
    KD_pad = _round_up(KD, 8)           # sublane-aligned contraction dim
    C_out_pad = _round_up(C_out, 8)     # sublane-aligned output-channel dim
    TM = min(tile_m, _round_up(M, 128))  # lane tile (multiple of 128)
    M_pad = _round_up(M, TM)
    num_m_tiles = M_pad // TM

    # --- im2col glue (plain JAX), built directly in transposed layout so the
    # --- big M axis lands on lanes. ---
    idx = jnp.arange(L_out)[:, None] * stride + jnp.arange(K)[None, :]   # [L_out, K]
    patches = x[:, :, idx]                                               # [B, C_in, L_out, K]
    patches_T = patches.transpose(1, 3, 0, 2).reshape(KD, M)             # [C_in*K, B*L_out]
    patches_T = jnp.pad(patches_T, ((0, KD_pad - KD), (0, M_pad - M)))
    patches_T = patches_T.astype(compute_dtype)

    w_flat = weight.reshape(C_out, KD)
    w_pad = jnp.pad(w_flat, ((0, C_out_pad - C_out), (0, KD_pad - KD)))
    w_pad = w_pad.astype(compute_dtype)
    b_pad = jnp.pad(bias.astype(jnp.float32), (0, C_out_pad - C_out)).reshape(C_out_pad, 1)

    # Advisory cost for XLA's scheduler.
    bytes_accessed = (
        patches_T.size * patches_T.dtype.itemsize
        + w_pad.size * w_pad.dtype.itemsize
        + b_pad.size * 4
        + C_out_pad * M_pad * 4
    )
    cost = pl.CostEstimate(
        flops=2 * M_pad * KD_pad * C_out_pad,
        transcendentals=0,
        bytes_accessed=bytes_accessed,
    )

    out_T = pl.pallas_call(
        _conv_matmul_kernel,
        out_shape=jax.ShapeDtypeStruct((C_out_pad, M_pad), jnp.float32),
        grid=(num_m_tiles,),
        in_specs=[
            pl.BlockSpec((C_out_pad, KD_pad), lambda i: (0, 0)),  # weights resident
            pl.BlockSpec((C_out_pad, 1), lambda i: (0, 0)),       # bias resident
            pl.BlockSpec((KD_pad, TM), lambda i: (0, i)),         # patch tile streams
        ],
        out_specs=pl.BlockSpec((C_out_pad, TM), lambda i: (0, i)),
        compiler_params=pltpu.CompilerParams(
            dimension_semantics=("parallel",),
            vmem_limit_bytes=32 * 1024 * 1024,
        ),
        cost_estimate=cost,
    )(w_pad, b_pad, patches_T)

    # [C_out_pad, M_pad] -> [C_out, M] -> [C_out, B, L_out] -> [B, C_out, L_out]
    # (transpose only permutes leading axes; the lane axis is untouched)
    out = out_T[:C_out, :M].reshape(C_out, B, L_out).transpose(1, 0, 2)
    return out


def init_conv1d_params(key, in_channels, out_channels, kernel_size):
    """Deterministic init mimicking PyTorch Conv1d defaults (uniform +-1/sqrt(fan_in))."""
    kw, kb = jax.random.split(key)
    fan_in = in_channels * kernel_size
    bound = 1.0 / (fan_in ** 0.5)
    weight = jax.random.uniform(
        kw, (out_channels, in_channels, kernel_size),
        minval=-bound, maxval=bound, dtype=jnp.float32)
    bias = jax.random.uniform(
        kb, (out_channels,), minval=-bound, maxval=bound, dtype=jnp.float32)
    return weight, bias


if __name__ == "__main__":
    # Module config (FD001-like, small): 14 features, window 30
    in_channels = 14
    out_channels = 8
    kernel_size = 5
    stride = 2
    batch = 2
    window = 30

    key = jax.random.PRNGKey(0)
    kx, kp = jax.random.split(key)
    x = jax.random.normal(kx, (batch, in_channels, window), dtype=jnp.float32)
    weight, bias = init_conv1d_params(kp, in_channels, out_channels, kernel_size)

    out = conv1d_pallas(x, weight, bias, stride)   # f32 path (bit-accurate check)
    out = jax.block_until_ready(out)

    # sanity check against plain-JAX conv reference
    ref = jax.lax.conv_general_dilated(
        x, weight, window_strides=(stride,), padding="VALID",
        dimension_numbers=("NCH", "OIH", "NCH")) + bias[None, :, None]
    L_out = (window - kernel_size) // stride + 1
    assert out.shape == (batch, out_channels, L_out)
    assert jnp.allclose(out, ref, atol=1e-5, rtol=1e-5)

    print("KERNEL_OK")
</pallas_src>

<mosaic_0001>
module attributes {stable_mosaic.version = 11 : i64} {
  func.func @_conv_matmul_kernel(%arg0: i32, %arg1: memref<8x72xf32, #tpu.memory_space<vmem>>, %arg2: memref<8x1xf32, #tpu.memory_space<vmem>>, %arg3: memref<72x128xf32, #tpu.memory_space<vmem>>, %arg4: memref<8x128xf32, #tpu.memory_space<vmem>>) attributes {dimension_semantics = [#tpu.dimension_semantics<parallel>], iteration_bounds = array<i64: 1>, scalar_prefetch = 0 : i64, scratch_operands = 0 : i64, tpu.core_type = #tpu.core_type<tc>, window_params = [{pipeline_mode = #tpu.pipeline_mode<synchronous>, transform_indices = @transform_0, window_bounds = array<i64: 8, 72>}, {pipeline_mode = #tpu.pipeline_mode<synchronous>, transform_indices = @transform_1, window_bounds = array<i64: 8, 1>}, {transform_indices = @transform_2, window_bounds = array<i64: 72, 128>}, {transform_indices = @transform_3, window_bounds = array<i64: 8, 128>}]} {
    %c0 = arith.constant 0 : index
    %c0_0 = arith.constant 0 : index
    %0 = vector.load %arg1[%c0, %c0_0] : memref<8x72xf32, #tpu.memory_space<vmem>>, vector<8x72xf32>
    %c0_1 = arith.constant 0 : index
    %c0_2 = arith.constant 0 : index
    %1 = vector.load %arg3[%c0_1, %c0_2] : memref<72x128xf32, #tpu.memory_space<vmem>>, vector<72x128xf32>
    %cst = arith.constant dense<0.000000e+00> : vector<8x128xf32>
    %2 = tpu.matmul %0, %1, %cst {dimension_numbers = #tpu.dot_dimension_numbers<[1], [0], [0], [1], [0, 0, 1, 1], [], []>} : vector<8x72xf32>, vector<72x128xf32>, vector<8x128xf32> -> vector<8x128xf32>
    %c0_3 = arith.constant 0 : index
    %c0_4 = arith.constant 0 : index
    %3 = vector.load %arg2[%c0_3, %c0_4] : memref<8x1xf32, #tpu.memory_space<vmem>>, vector<8x1xf32>
    %4 = vector.broadcast %3 : vector<8x1xf32> to vector<8x128xf32>
    %5 = arith.addf %2, %4 : vector<8x128xf32>
    %c0_5 = arith.constant 0 : index
    %c0_6 = arith.constant 0 : index
    %6 = vector.load %arg4[%c0_5, %c0_6] : memref<8x128xf32, #tpu.memory_space<vmem>>, vector<8x128xf32>
    tpu.vector_store %arg4[%c0_5, %c0_6], %5 {strides = array<i32>} : memref<8x128xf32, #tpu.memory_space<vmem>>, vector<8x128xf32>,
    return
  }
  func.func @transform_0(%arg0: i32) -> (i32, i32) {
    %c0_i32 = arith.constant 0 : i32
    %c0_i32_0 = arith.constant 0 : i32
    %c0_i32_1 = arith.constant 0 : i32
    return %c0_i32, %c0_i32_0 : i32, i32
  }
  func.func @transform_1(%arg0: i32) -> (i32, i32) {
    %c0_i32 = arith.constant 0 : i32
    %c0_i32_0 = arith.constant 0 : i32
    %c0_i32_1 = arith.constant 0 : i32
    return %c0_i32, %c0_i32_0 : i32, i32
  }
  func.func @transform_2(%arg0: i32) -> (i32, i32) {
    %c0_i32 = arith.constant 0 : i32
    %c0_i32_0 = arith.constant 0 : i32
    return %c0_i32, %arg0 : i32, i32
  }
  func.func @transform_3(%arg0: i32) -> (i32, i32) {
    %c0_i32 = arith.constant 0 : i32
    %c0_i32_0 = arith.constant 0 : i32
    return %c0_i32, %arg0 : i32, i32
  }
}

</mosaic_0001>

<bundles_post_ra>
// kernel: tpu_custom_call.1
= control target key start
LH: loop header
LB: loop body
LE: loop exit
PB: predicated region body
PF: predicated region fallthrough
CT: control target
= control target key end

     0   :  { %8 = vsyncpa [#allocation3], 0  ;;  %s294_s0 = inlined_call_operand.vmem [shape: f32[8,72], index: 0, kind: input, shape index: {}]   ;;  %s295_s1 = inlined_call_operand.vmem [shape: f32[8,1], index: 1, kind: input, shape index: {}]   ;;  %s296_s2 = inlined_call_operand.hbm [shape: f32[72,128], index: 2, kind: input, shape index: {}]   ;;  %s297_s3 = inlined_call_operand.hbm [shape: f32[8,128], index: 3, kind: output, shape index: {}]  }
   0x1   :  { %9 = vsyncpa [#allocation4], 0  ;;  %s236_s12 = smov [#allocation2]   ;;  %s188_s16 = scalar_lea.hbm %s296_s2, 1152 }
   0x2   :  { %s19_s13 = sshll.u32 %s236_s12, 4  ;;  %p189_p0 = scmp.ne.s32.totalorder %s296_s2, %s188_s16  ;;  %s20_s13 = int_to_ptr.vmem [resolvable:$true] %s19_s13 }
   0x3   :  { %p192_p1 = scmp.lt.u32.totalorder %s188_s16, %s296_s2 }
   0x5   :  { %p194_p2 = pnand %p192_p1, %p189_p0 }
   0x7   :  { %197 = shalt.err (!%p194_p2)
}
   0x8   :  { %s198_s21 = scalar_lea.vmem %s20_s13, 1152  ;;  %p203_p4 = scmp.lt.s32.totalorder %s20_s13, %s20_s13 }
   0x9   :  { %p199_p3 = scmp.ne.s32.totalorder %s20_s13, %s198_s21  ;;  %p204_p5 = scmp.lt.s32.totalorder %s198_s21, %s198_s21 }
   0xb   :  { %p205_p6 = por %p204_p5, %p203_p4 }
   0xd   :  { %p206_p7 = pnand %p205_p6, %p199_p3 }
   0xf   :  { %209 = shalt.err (!%p206_p7)
}
  0x10   :  { %s237_s22 = smov 128   ;;  %s238_s23 = smov 8  }
  0x11   :  { %25 = dma.hbm_to_vmem [thread:$0]  %s296_s2, 1152, %s20_s13, [#allocation3], %s237_s22, %s237_s22, %s238_s23  }
  0x12   :  { %232 = dma.done.wait [#allocation3], 1152  }
  0x13   :  { %233 = vsyncadd [#allocation3], 4294966144  ;;  %v239_v0 = vmov 0.0|0.0   ;;  %vm240_vm0 = vmmov 0   ;;  %v241_v1 = vmov 0.0   ;;  %v242_v2 = vmov 0  }
  0x14   :  { %167 = vmatprep.subr.bf16.mxu0 %v239_v0  ;;  %164 = vmatprep.mubr.msk.f32.mxu0 %vm240_vm0, %v241_v1  ;;  %v30_v3 = vld [vmem:[#allocation2] sm:$0xff]  ;;  %v31_v4 = vld [vmem:[#allocation2 + $0x8] sm:$0xff]  ;;  %v32_v5 = vld [vmem:[#allocation2 + $0x10] sm:$0xff]  ;;  %vm45_vm1 = vcmask 588800  }
  0x15   :  { %187 = vset.pattern.permute.xlu0 %v242_v2  ;;  %v168_v6 = vpack.c.bf16 %v31_v4, %v30_v3  ;;  %v33_v7 = vld [vmem:[#allocation2 + $0x18] sm:$0xff]  ;;  %v39_v9 = vld [vmem:[%s295_s1] sm:$0xff]  ;;  %v35_v11 = vld [vmem:[#allocation2 + $0x28] sm:$0xff]  ;;  %s243_s1 = smov [#allocation5]  }
  0x16   :  { %v171_v8 = vpack.c.bf16 %v33_v7, %v32_v5  ;;  %v34_v10 = vld [vmem:[#allocation2 + $0x20] sm:$0xff]  ;;  %42 = vperm.xlu0 %187, %v39_v9   ;;  %v36_v13 = vld [vmem:[#allocation2 + $0x30] sm:$0xff]  ;;  %v37_v14 = vld [vmem:[#allocation2 + $0x38] sm:$0xff]  ;;  %s126_s29 = sshll.u32 %s243_s1, 4  ;;  %s127_s29 = int_to_ptr.vmem [resolvable:$true] %s126_s29 }
  0x17   :  { %169 = vmatpush3.bf16.msra.mxu0 %v168_v6  ;;  %v174_v12 = vpack.c.bf16 %v35_v11, %v34_v10  ;;  %v177_v15 = vpack.c.bf16 %v37_v14, %v36_v13  ;;  %v38_v16 = vld [vmem:[#allocation2 + $0x40] sm:$0xff]  ;;  %s210_s30 = scalar_lea.vmem %s127_s29, 128  ;;  %p215_p9 = scmp.lt.s32.totalorder %s127_s29, %s127_s29 }
  0x18   :  { %170 = vmatprep.subr.bf16.mxu0 %v239_v0  ;;  %v29_v17 = vld [vmem:[%s294_s0] sm:$0xff]  ;;  %p211_p8 = scmp.ne.s32.totalorder %s127_s29, %s210_s30  ;;  %p216_p10 = scmp.lt.s32.totalorder %s210_s30, %s210_s30 }
  0x1a   :  { %p217_p11 = por %p216_p10, %p215_p9 }
  0x1b   :  { %172 = vmatpush3.bf16.msra.mxu0 %v171_v8 }
  0x1c   :  { %173 = vmatprep.subr.bf16.mxu0 %v239_v0  ;;  %p218_p12 = pnand %p217_p11, %p211_p8 }
  0x1f   :  { %175 = vmatpush3.bf16.msra.mxu0 %v174_v12 }
  0x20   :  { %176 = vmatprep.subr.bf16.mxu0 %v239_v0 }
  0x23   :  { %178 = vmatpush3.bf16.msra.mxu0 %v177_v15 }
  0x24   :  { %162 = vmatprep.subr.mxu0 %v241_v1 }
  0x27   :  { %163 = vmatpush3.msra.mxu0 %v38_v16 }
  0x28   :  { %165 = vmatmul.mubr.msk.f32.vlgmr.msra.gmra.mrb[0].mxu0 %vm45_vm1, %v29_v17 }
  0x95   :  { %v43_v18 = vpop.permute.xlu0 %42 }
  0xfb   :  { %v115_v19 = vpop.f32.mrb[0].mxu0 }
  0xfc   :  { %v116_v20 = vadd.f32 %v115_v19, %v43_v18  ;;  %v166_v21 = vpop.f32.mrb[1].mxu0 }
  0xfe   :  { %119 = vst [vmem:[#allocation5] sm:$0xff] %v116_v20 }
  0xff   :  { %221 = shalt.err (!%p218_p12)
}
 0x100   :  { %s222_s5 = scalar_lea.hbm %s297_s3, 128 }
 0x101   :  { %p223_p13 = scmp.ne.s32.totalorder %s297_s3, %s222_s5  ;;  %p226_p0 = scmp.lt.u32.totalorder %s222_s5, %s297_s3 }
 0x103   :  { %p228_p1 = pnand %p226_p0, %p223_p13 }
 0x105   :  { %231 = shalt.err (!%p228_p1)
}
 0x106   :  { %129 = dma.vmem_to_hbm [thread:$0]  %s127_s29, 128, %s297_s3, [#allocation4]  }
 0x107   :  { %234 = dma.done.wait [#allocation4], 128  }
 0x108   :  { %235 = vsyncadd [#allocation4], 4294967168 }
 0x109   :  { %133 = vsyncpa [#allocation3], 1 }
 0x10a   :  { %134 = vsyncpa [#allocation4], 1 }

</bundles_post_ra>
